<compile_context>
chip_gen: v5e
topology: v5e:2x2
jax: 0.10.0
libtpu: 0.0.40
codegen_flags: <defaults>
</compile_context>

<pallas_src>
import math
from typing import NamedTuple

import jax
import jax.numpy as jnp
from jax.experimental import pallas as pl
from jax.experimental.pallas import tpu as pltpu


# ---------------------------------------------------------------------------
# Small helpers.
# ---------------------------------------------------------------------------
def _round_up(x, m):
    return ((x + m - 1) // m) * m


def _pad2(a, rows, cols):
    r, c = a.shape
    if r == rows and c == cols:
        return a
    return jnp.pad(a, ((0, rows - r), (0, cols - c)))


def _gelu_tanh(x):
    # tanh-form GELU: the transcendental goes to the (otherwise idle) EUP slot,
    # cutting VALU work ~2-3x vs an erf polynomial.  Max |err| vs exact-erf
    # GELU ~1e-3, far below this head's bf16 tolerance.
    c = math.sqrt(2.0 / math.pi)
    return 0.5 * x * (1.0 + jnp.tanh(c * (x + 0.044715 * (x * x * x))))


def _vmem_capacity_bytes():
    # Capability probe only (conservative fallback = v7x per-core 64 MiB);
    # it never masks a kernel failure.
    try:
        return int(pltpu.get_tpu_info().vmem_capacity_bytes)
    except Exception:  # pragma: no cover - info unavailable in some setups
        return 64 * 2**20


def _supports_buffered():
    # Narrow probe: only BlockSpec *construction* with pipeline_mode is tried.
    try:
        pl.BlockSpec((8, 128), lambda i: (0, 0), pipeline_mode=pl.Buffered(1))
        return True
    except (AttributeError, TypeError):  # pragma: no cover - older jax
        return False


def _const_spec(shape, single_buffer):
    # Block never changes across the grid; single-buffer it when supported to
    # halve the resident VMEM for the constant operands.
    index_map = lambda *_: (0,) * len(shape)
    if single_buffer:
        return pl.BlockSpec(shape, index_map, pipeline_mode=pl.Buffered(1))
    return pl.BlockSpec(shape, index_map)


# ---------------------------------------------------------------------------
# Kernels.
# ---------------------------------------------------------------------------
def _mlp_norm_kernel(x_ref, w1_ref, b1_ref, w2_ref, b2_ref, w3_ref, b3_ref,
                     z_ref):
    h = jnp.dot(x_ref[...], w1_ref[...], preferred_element_type=jnp.float32)
    h = _gelu_tanh(h + b1_ref[...])
    h = jnp.dot(h.astype(w2_ref.dtype), w2_ref[...],
                preferred_element_type=jnp.float32)
    h = _gelu_tanh(h + b2_ref[...])
    z = jnp.dot(h.astype(w3_ref.dtype), w3_ref[...],
                preferred_element_type=jnp.float32) + b3_ref[...]
    # F.normalize(z, dim=-1, p=2) == z / max(||z||_2, 1e-12); f32 throughout.
    ss = jnp.sum(z * z, axis=-1, keepdims=True)
    z = z * jax.lax.rsqrt(jnp.maximum(ss, 1e-24))
    z_ref[...] = z.astype(z_ref.dtype)


def _last_layer_kernel(z_ref, wl_ref, o_ref):
    o_ref[...] = jnp.dot(z_ref[...], wl_ref[...],
                         preferred_element_type=jnp.float32).astype(o_ref.dtype)


# ---------------------------------------------------------------------------
# One-off weight preparation (hoisted out of the forward path).
# ---------------------------------------------------------------------------
class PreparedDINOHead(NamedTuple):
    w1: jax.Array      # (Dp, Hp)   compute dtype
    b1: jax.Array      # (1, Hp)    f32
    w2: jax.Array      # (Hp, Hp)   compute dtype
    b2: jax.Array      # (1, Hp)    f32
    w3: jax.Array      # (Hp, Kbp)  compute dtype
    b3: jax.Array      # (1, Kbp)   f32
    wl: jax.Array      # (Kbp, Op)  weight-normalized last layer (transposed)
    in_dim: int
    out_dim: int


def prepare_params(params, *, compute_dtype=jnp.bfloat16):
    """weight_norm + transpose + pad + cast; call once per weight update."""
    w1, b1, w2, b2, w3, b3, v, g = params
    D, H = w1.shape
    Kb = w3.shape[1]
    O = v.shape[0]

    # weight_norm forward semantics: W = g * V / ||V||_row, then transpose.
    v32 = v.astype(jnp.float32)
    v_norm = jnp.sqrt(jnp.sum(v32 * v32, axis=1, keepdims=True))
    wl = (v32 * (g.astype(jnp.float32) / v_norm)).T          # (Kb, O)

    Dp = _round_up(D, 128)
    Hp = _round_up(H, 128)
    Kbp = _round_up(Kb, 128)
    Op = _round_up(O, 128)

    cd = compute_dtype
    return PreparedDINOHead(
        w1=_pad2(w1, Dp, Hp).astype(cd),
        b1=_pad2(b1.reshape(1, -1), 1, Hp).astype(jnp.float32),
        w2=_pad2(w2, Hp, Hp).astype(cd),
        b2=_pad2(b2.reshape(1, -1), 1, Hp).astype(jnp.float32),
        w3=_pad2(w3, Hp, Kbp).astype(cd),
        b3=_pad2(b3.reshape(1, -1), 1, Kbp).astype(jnp.float32),
        wl=_pad2(wl, Kbp, Op).astype(cd),
        in_dim=int(D), out_dim=int(O))


# ---------------------------------------------------------------------------
# Forward wrapper.
# ---------------------------------------------------------------------------
def dino_head_forward(x, prepared, *, tile_m=None, tile_n=None,
                      out_dtype=jnp.float32):
    """x: (..., in_dim) -> (..., out_dim).  `prepared` from prepare_params().

    For production out_dim (~65536) consider out_dtype=jnp.bfloat16: the logits
    write is the dominant HBM stream and bf16 halves it.
    """
    p = prepared
    cd = p.w1.dtype
    Dp, Hp = p.w1.shape
    Kbp, Op = p.wl.shape
    D, O = p.in_dim, p.out_dim

    lead = x.shape[:-1]
    assert x.shape[-1] == D, (x.shape, D)
    x2 = x.reshape(-1, D)
    M = x2.shape[0]

    # ---- tiling --------------------------------------------------------
    if tile_m is None:
        tile_m = min(256, _round_up(M, 16))
    tile_m = _round_up(tile_m, 16)
    if tile_n is None:
        # Large lane-dense output tiles: few grid steps, big contiguous wl DMAs.
        tile_n = min(2048, Op)
    tile_n = min(_round_up(tile_n, 128), Op)

    Mp = _round_up(M, tile_m)
    x_p = _pad2(x2, Mp, Dp).astype(cd)

    ni = Mp // tile_m
    nj = Op // tile_n
    cb = jnp.dtype(cd).itemsize
    ob = jnp.dtype(out_dtype).itemsize
    vmem_cap = _vmem_capacity_bytes() - 4 * 2**20           # leave headroom
    single_buffer = _supports_buffered()

    # ==== kernel 1: MLP + L2-normalize -> z (Mp, Kbp) ====================
    wmul = 1 if single_buffer else 2
    est1 = (wmul * ((Dp * Hp + Hp * Hp + Hp * Kbp) * cb + (2 * Hp + Kbp) * 4)
            + 2 * tile_m * Dp * cb              # x tiles (double-buffered)
            + 2 * tile_m * Kbp * cb             # z output tiles
            + 3 * tile_m * Hp * 4)              # f32 intermediates headroom
    limit1 = int(min(vmem_cap, max(32 * 2**20, 1.25 * est1)))

    cost1 = pl.CostEstimate(
        flops=2 * M * (D * Hp + Hp * Hp + Hp * Kbp),
        transcendentals=2 * M * Hp,
        bytes_accessed=(M * D + D * Hp + Hp * Hp + Hp * Kbp) * cb
        + M * Kbp * cb)

    z = pl.pallas_call(
        _mlp_norm_kernel,
        out_shape=jax.ShapeDtypeStruct((Mp, Kbp), cd),
        grid_spec=pltpu.PrefetchScalarGridSpec(
            num_scalar_prefetch=0,
            grid=(ni,),
            in_specs=[
                pl.BlockSpec((tile_m, Dp), lambda i: (i, 0)),        # x rows
                _const_spec((Dp, Hp), single_buffer),                # linear 1
                _const_spec((1, Hp), single_buffer),
                _const_spec((Hp, Hp), single_buffer),                # linear 2
                _const_spec((1, Hp), single_buffer),
                _const_spec((Hp, Kbp), single_buffer),               # linear 3
                _const_spec((1, Kbp), single_buffer),
            ],
            out_specs=pl.BlockSpec((tile_m, Kbp), lambda i: (i, 0)),
        ),
        compiler_params=pltpu.CompilerParams(
            dimension_semantics=("parallel",),
            vmem_limit_bytes=limit1),
        cost_estimate=cost1,
    )(x_p, p.w1, p.b1, p.w2, p.b2, p.w3, p.b3)

    # ==== kernel 2: out = z @ wl =========================================
    # Column axis OUTER: the wl block index changes only nj times, so wl is
    # streamed from HBM exactly once per forward; z tiles (tiny) cycle inside.
    est2 = (2 * tile_m * Kbp * cb               # z tiles
            + 2 * Kbp * tile_n * cb             # wl tiles
            + 2 * tile_m * tile_n * ob          # output tiles
            + tile_m * tile_n * 4)              # f32 accumulator headroom
    limit2 = int(min(vmem_cap, max(32 * 2**20, 1.25 * est2)))

    cost2 = pl.CostEstimate(
        flops=2 * M * Kbp * O,
        transcendentals=0,
        bytes_accessed=(M * Kbp + Kbp * O) * cb + M * O * ob)

    out = pl.pallas_call(
        _last_layer_kernel,
        out_shape=jax.ShapeDtypeStruct((Mp, Op), out_dtype),
        grid_spec=pltpu.PrefetchScalarGridSpec(
            num_scalar_prefetch=0,
            grid=(nj, ni),
            in_specs=[
                pl.BlockSpec((tile_m, Kbp), lambda j, i: (i, 0)),    # z rows
                pl.BlockSpec((Kbp, tile_n), lambda j, i: (0, j)),    # wl cols
            ],
            out_specs=pl.BlockSpec((tile_m, tile_n), lambda j, i: (i, j)),
        ),
        compiler_params=pltpu.CompilerParams(
            dimension_semantics=("parallel", "arbitrary"),
            vmem_limit_bytes=limit2),
        cost_estimate=cost2,
    )(z, p.wl)

    return out[:M, :O].reshape(*lead, O)


# ---------------------------------------------------------------------------
# Deterministic parameter init (matching DINOHead.__init__ defaults).
# Linear weights: trunc_normal(std=0.02), biases 0.  Last layer: weight_norm'd
# Linear (bias=False), torch default direction init, weight_g filled with 1.
# ---------------------------------------------------------------------------
def init_params(key, in_dim, hidden_dim, bottleneck_dim, out_dim,
                dtype=jnp.float32):
    ks = jax.random.split(key, 4)

    def trunc_normal(k, shape, std=0.02):
        return (std * jax.random.truncated_normal(k, -2.0, 2.0, shape)).astype(dtype)

    w1 = trunc_normal(ks[0], (in_dim, hidden_dim))
    w2 = trunc_normal(ks[1], (hidden_dim, hidden_dim))
    w3 = trunc_normal(ks[2], (hidden_dim, bottleneck_dim))
    b1 = jnp.zeros((1, hidden_dim), dtype)
    b2 = jnp.zeros((1, hidden_dim), dtype)
    b3 = jnp.zeros((1, bottleneck_dim), dtype)
    bound = 1.0 / math.sqrt(bottleneck_dim)
    v = jax.random.uniform(ks[3], (out_dim, bottleneck_dim), dtype,
                           minval=-bound, maxval=bound)
    g = jnp.ones((out_dim, 1), dtype)
    return (w1, b1, w2, b2, w3, b3, v, g)


# ---------------------------------------------------------------------------
# Pure-JAX f32 reference (same semantics as the PyTorch forward).
# ---------------------------------------------------------------------------
def dino_head_reference(x, params):
    w1, b1, w2, b2, w3, b3, v, g = params

    def gelu(t):  # exact-erf GELU (torch.nn.GELU default)
        return 0.5 * t * (1.0 + jax.scipy.special.erf(t / jnp.sqrt(2.0)))

    h = gelu(x @ w1 + b1)
    h = gelu(h @ w2 + b2)
    z = h @ w3 + b3
    z = z / jnp.maximum(jnp.linalg.norm(z, axis=-1, keepdims=True), 1e-12)
    wl = (v * (g / jnp.linalg.norm(v, axis=1, keepdims=True))).T
    return z @ wl


if __name__ == "__main__":
    # Small shapes consistent with the module (scaled-down DINOHead defaults).
    batch, in_dim, hidden_dim, bottleneck_dim, out_dim = 8, 32, 64, 24, 96

    key = jax.random.PRNGKey(0)
    kx, kp = jax.random.split(key)
    x = jax.random.normal(kx, (batch, in_dim), dtype=jnp.float32)
    params = init_params(kp, in_dim, hidden_dim, bottleneck_dim, out_dim)

    prepared = prepare_params(params)          # once per weight update
    out = dino_head_forward(x, prepared)
    out = jax.block_until_ready(out)

    ref = dino_head_reference(x, params)
    assert out.shape == (batch, out_dim), out.shape
    assert bool(jnp.all(jnp.isfinite(out)))
    err = float(jnp.max(jnp.abs(out - ref)))
    # bf16 MXU inputs / bf16 z with f32 accumulation + tanh-GELU vs the
    # exact-erf f32 reference -> loosened tolerance.
    assert err < 3e-2, err

    print("KERNEL_OK")
</pallas_src>

<mosaic_0001>
module attributes {stable_mosaic.version = 11 : i64} {
  func.func @_mlp_norm_kernel(%arg0: i32, %arg1: memref<16x128xbf16, #tpu.memory_space<vmem>>, %arg2: memref<128x128xbf16, #tpu.memory_space<vmem>>, %arg3: memref<1x128xf32, #tpu.memory_space<vmem>>, %arg4: memref<128x128xbf16, #tpu.memory_space<vmem>>, %arg5: memref<1x128xf32, #tpu.memory_space<vmem>>, %arg6: memref<128x128xbf16, #tpu.memory_space<vmem>>, %arg7: memref<1x128xf32, #tpu.memory_space<vmem>>, %arg8: memref<16x128xbf16, #tpu.memory_space<vmem>>) attributes {dimension_semantics = [#tpu.dimension_semantics<parallel>], iteration_bounds = array<i64: 1>, scalar_prefetch = 0 : i64, scratch_operands = 0 : i64, tpu.core_type = #tpu.core_type<tc>, window_params = [{transform_indices = @transform_0, window_bounds = array<i64: 16, 128>}, {pipeline_mode = #tpu.pipeline_mode<synchronous>, transform_indices = @transform_1, window_bounds = array<i64: 128, 128>}, {pipeline_mode = #tpu.pipeline_mode<synchronous>, transform_indices = @transform_2, window_bounds = array<i64: 1, 128>}, {pipeline_mode = #tpu.pipeline_mode<synchronous>, transform_indices = @transform_3, window_bounds = array<i64: 128, 128>}, {pipeline_mode = #tpu.pipeline_mode<synchronous>, transform_indices = @transform_4, window_bounds = array<i64: 1, 128>}, {pipeline_mode = #tpu.pipeline_mode<synchronous>, transform_indices = @transform_5, window_bounds = array<i64: 128, 128>}, {pipeline_mode = #tpu.pipeline_mode<synchronous>, transform_indices = @transform_6, window_bounds = array<i64: 1, 128>}, {transform_indices = @transform_7, window_bounds = array<i64: 16, 128>}]} {
    %c0 = arith.constant 0 : index
    %c0_0 = arith.constant 0 : index
    %0 = vector.load %arg1[%c0, %c0_0] : memref<16x128xbf16, #tpu.memory_space<vmem>>, vector<16x128xbf16>
    %c0_1 = arith.constant 0 : index
    %c0_2 = arith.constant 0 : index
    %1 = vector.load %arg2[%c0_1, %c0_2] : memref<128x128xbf16, #tpu.memory_space<vmem>>, vector<128x128xbf16>
    %cst = arith.constant dense<0.000000e+00> : vector<16x128xf32>
    %2 = tpu.matmul %0, %1, %cst {dimension_numbers = #tpu.dot_dimension_numbers<[1], [0], [0], [1], [0, 0, 1, 1], [], []>} : vector<16x128xbf16>, vector<128x128xbf16>, vector<16x128xf32> -> vector<16x128xf32>
    %c0_3 = arith.constant 0 : index
    %c0_4 = arith.constant 0 : index
    %3 = vector.load %arg3[%c0_3, %c0_4] : memref<1x128xf32, #tpu.memory_space<vmem>>, vector<1x128xf32>
    %4 = vector.broadcast %3 : vector<1x128xf32> to vector<16x128xf32>
    %5 = arith.addf %2, %4 : vector<16x128xf32>
    %cst_5 = arith.constant 5.000000e-01 : f32
    %6 = vector.broadcast %cst_5 : f32 to vector<16x128xf32>
    %7 = arith.mulf %6, %5 : vector<16x128xf32>
    %8 = arith.mulf %5, %5 : vector<16x128xf32>
    %9 = arith.mulf %8, %5 : vector<16x128xf32>
    %cst_6 = arith.constant 4.471500e-02 : f32
    %10 = vector.broadcast %cst_6 : f32 to vector<16x128xf32>
    %11 = arith.mulf %10, %9 : vector<16x128xf32>
    %12 = arith.addf %5, %11 : vector<16x128xf32>
    %cst_7 = arith.constant 0.797884583 : f32
    %13 = vector.broadcast %cst_7 : f32 to vector<16x128xf32>
    %14 = arith.mulf %13, %12 : vector<16x128xf32>
    %15 = math.tanh %14 : vector<16x128xf32>
    %cst_8 = arith.constant 1.000000e+00 : f32
    %16 = vector.broadcast %cst_8 : f32 to vector<16x128xf32>
    %17 = arith.addf %16, %15 : vector<16x128xf32>
    %18 = arith.mulf %7, %17 : vector<16x128xf32>
    %19 = arith.truncf %18 : vector<16x128xf32> to vector<16x128xbf16>
    %c0_9 = arith.constant 0 : index
    %c0_10 = arith.constant 0 : index
    %20 = vector.load %arg4[%c0_9, %c0_10] : memref<128x128xbf16, #tpu.memory_space<vmem>>, vector<128x128xbf16>
    %cst_11 = arith.constant dense<0.000000e+00> : vector<16x128xf32>
    %21 = tpu.matmul %19, %20, %cst_11 {dimension_numbers = #tpu.dot_dimension_numbers<[1], [0], [0], [1], [0, 0, 1, 1], [], []>} : vector<16x128xbf16>, vector<128x128xbf16>, vector<16x128xf32> -> vector<16x128xf32>
    %c0_12 = arith.constant 0 : index
    %c0_13 = arith.constant 0 : index
    %22 = vector.load %arg5[%c0_12, %c0_13] : memref<1x128xf32, #tpu.memory_space<vmem>>, vector<1x128xf32>
    %23 = vector.broadcast %22 : vector<1x128xf32> to vector<16x128xf32>
    %24 = arith.addf %21, %23 : vector<16x128xf32>
    %cst_14 = arith.constant 5.000000e-01 : f32
    %25 = vector.broadcast %cst_14 : f32 to vector<16x128xf32>
    %26 = arith.mulf %25, %24 : vector<16x128xf32>
    %27 = arith.mulf %24, %24 : vector<16x128xf32>
    %28 = arith.mulf %27, %24 : vector<16x128xf32>
    %cst_15 = arith.constant 4.471500e-02 : f32
    %29 = vector.broadcast %cst_15 : f32 to vector<16x128xf32>
    %30 = arith.mulf %29, %28 : vector<16x128xf32>
    %31 = arith.addf %24, %30 : vector<16x128xf32>
    %cst_16 = arith.constant 0.797884583 : f32
    %32 = vector.broadcast %cst_16 : f32 to vector<16x128xf32>
    %33 = arith.mulf %32, %31 : vector<16x128xf32>
    %34 = math.tanh %33 : vector<16x128xf32>
    %cst_17 = arith.constant 1.000000e+00 : f32
    %35 = vector.broadcast %cst_17 : f32 to vector<16x128xf32>
    %36 = arith.addf %35, %34 : vector<16x128xf32>
    %37 = arith.mulf %26, %36 : vector<16x128xf32>
    %38 = arith.truncf %37 : vector<16x128xf32> to vector<16x128xbf16>
    %c0_18 = arith.constant 0 : index
    %c0_19 = arith.constant 0 : index
    %39 = vector.load %arg6[%c0_18, %c0_19] : memref<128x128xbf16, #tpu.memory_space<vmem>>, vector<128x128xbf16>
    %cst_20 = arith.constant dense<0.000000e+00> : vector<16x128xf32>
    %40 = tpu.matmul %38, %39, %cst_20 {dimension_numbers = #tpu.dot_dimension_numbers<[1], [0], [0], [1], [0, 0, 1, 1], [], []>} : vector<16x128xbf16>, vector<128x128xbf16>, vector<16x128xf32> -> vector<16x128xf32>
    %c0_21 = arith.constant 0 : index
    %c0_22 = arith.constant 0 : index
    %41 = vector.load %arg7[%c0_21, %c0_22] : memref<1x128xf32, #tpu.memory_space<vmem>>, vector<1x128xf32>
    %42 = vector.broadcast %41 : vector<1x128xf32> to vector<16x128xf32>
    %43 = arith.addf %40, %42 : vector<16x128xf32>
    %44 = arith.mulf %43, %43 : vector<16x128xf32>
    %cst_23 = arith.constant dense<0.000000e+00> : vector<16xf32>
    %45 = vector.multi_reduction <add>, %44, %cst_23 [1] : vector<16x128xf32> to vector<16xf32>
    %46 = vector.shape_cast %45 : vector<16xf32> to vector<16x1xf32>
    %cst_24 = arith.constant 1.000000e-24 : f32
    %47 = vector.broadcast %cst_24 : f32 to vector<16x1xf32>
    %48 = arith.maximumf %46, %47 : vector<16x1xf32>
    %49 = math.rsqrt %48 : vector<16x1xf32>
    %50 = vector.broadcast %49 : vector<16x1xf32> to vector<16x128xf32>
    %51 = arith.mulf %43, %50 : vector<16x128xf32>
    %52 = arith.truncf %51 : vector<16x128xf32> to vector<16x128xbf16>
    %c0_25 = arith.constant 0 : index
    %c0_26 = arith.constant 0 : index
    %53 = vector.load %arg8[%c0_25, %c0_26] : memref<16x128xbf16, #tpu.memory_space<vmem>>, vector<16x128xbf16>
    tpu.vector_store %arg8[%c0_25, %c0_26], %52 {strides = array<i32>} : memref<16x128xbf16, #tpu.memory_space<vmem>>, vector<16x128xbf16>,
    return
  }
  func.func @transform_0(%arg0: i32) -> (i32, i32) {
    %c0_i32 = arith.constant 0 : i32
    %c0_i32_0 = arith.constant 0 : i32
    return %arg0, %c0_i32 : i32, i32
  }
  func.func @transform_1(%arg0: i32) -> (i32, i32) {
    %c0_i32 = arith.constant 0 : i32
    %c0_i32_0 = arith.constant 0 : i32
    %c0_i32_1 = arith.constant 0 : i32
    return %c0_i32, %c0_i32_0 : i32, i32
  }
  func.func @transform_2(%arg0: i32) -> (i32, i32) {
    %c0_i32 = arith.constant 0 : i32
    %c0_i32_0 = arith.constant 0 : i32
    %c0_i32_1 = arith.constant 0 : i32
    return %c0_i32, %c0_i32_0 : i32, i32
  }
  func.func @transform_3(%arg0: i32) -> (i32, i32) {
    %c0_i32 = arith.constant 0 : i32
    %c0_i32_0 = arith.constant 0 : i32
    %c0_i32_1 = arith.constant 0 : i32
    return %c0_i32, %c0_i32_0 : i32, i32
  }
  func.func @transform_4(%arg0: i32) -> (i32, i32) {
    %c0_i32 = arith.constant 0 : i32
    %c0_i32_0 = arith.constant 0 : i32
    %c0_i32_1 = arith.constant 0 : i32
    return %c0_i32, %c0_i32_0 : i32, i32
  }
  func.func @transform_5(%arg0: i32) -> (i32, i32) {
    %c0_i32 = arith.constant 0 : i32
    %c0_i32_0 = arith.constant 0 : i32
    %c0_i32_1 = arith.constant 0 : i32
    return %c0_i32, %c0_i32_0 : i32, i32
  }
  func.func @transform_6(%arg0: i32) -> (i32, i32) {
    %c0_i32 = arith.constant 0 : i32
    %c0_i32_0 = arith.constant 0 : i32
    %c0_i32_1 = arith.constant 0 : i32
    return %c0_i32, %c0_i32_0 : i32, i32
  }
  func.func @transform_7(%arg0: i32) -> (i32, i32) {
    %c0_i32 = arith.constant 0 : i32
    %c0_i32_0 = arith.constant 0 : i32
    return %arg0, %c0_i32 : i32, i32
  }
}

</mosaic_0001>

<bundles_post_ra>
// kernel: tpu_custom_call.1
= control target key start
LH: loop header
LB: loop body
LE: loop exit
PB: predicated region body
PF: predicated region fallthrough
CT: control target
= control target key end

     0   :  { %12 = vsyncpa [#allocation3], 0  ;;  %s803_s0 = inlined_call_operand.hbm [shape: bf16[16,128], index: 0, kind: input, shape index: {}]   ;;  %s804_s1 = inlined_call_operand.hbm [shape: bf16[128,128], index: 1, kind: input, shape index: {}]   ;;  %s805_s2 = inlined_call_operand.vmem [shape: f32[1,128], index: 2, kind: input, shape index: {}]   ;;  %s806_s3 = inlined_call_operand.hbm [shape: bf16[128,128], index: 3, kind: input, shape index: {}]   ;;  %s807_s4 = inlined_call_operand.vmem [shape: f32[1,128], index: 4, kind: input, shape index: {}]   ;;  %s808_s5 = inlined_call_operand.hbm [shape: bf16[128,128], index: 5, kind: input, shape index: {}]   ;;  %s809_s6 = inlined_call_operand.vmem [shape: f32[1,128], index: 6, kind: input, shape index: {}]   ;;  %s810_s7 = inlined_call_operand.hbm [shape: bf16[16,128], index: 7, kind: output, shape index: {}]  }
   0x1   :  { %13 = vsyncpa [#allocation6], 0 }
   0x2   :  { %14 = vsyncpa [#allocation9], 0 }
   0x3   :  { %15 = vsyncpa [#allocation4], 0  ;;  %s33_s26 = sshll.u32 %s804_s1, 4  ;;  %s717_s27 = smov [#allocation5]   ;;  %s34_s26 = int_to_ptr.hbm [resolvable:$true] %s33_s26 }
   0x4   :  { %s35_s28 = sshll.u32 %s717_s27, 4  ;;  %s20_s8 = sshll.u32 %s803_s0, 4  ;;  %s36_s28 = int_to_ptr.vmem [resolvable:$true] %s35_s28  ;;  %s21_s8 = int_to_ptr.hbm [resolvable:$true] %s20_s8 }
   0x5   :  { %s718_s9 = smov 64   ;;  %s719_s10 = smov 4  }
   0x6   :  { %41 = dma.hbm_to_vmem [thread:$0]  %s34_s26, 1024, %s36_s28, [#allocation6], %s718_s9, %s718_s9, %s719_s10  }
   0x7   :  { %s720_s11 = smov [#allocation2]   ;;  %s48_s1 = sshll.u32 %s806_s3, 4  ;;  %s49_s1 = int_to_ptr.hbm [resolvable:$true] %s48_s1 }
   0x8   :  { %s22_s12 = sshll.u32 %s720_s11, 4  ;;  %s63_s16 = sshll.u32 %s808_s5, 4  ;;  %s23_s12 = int_to_ptr.vmem [resolvable:$true] %s22_s12  ;;  %s64_s16 = int_to_ptr.hbm [resolvable:$true] %s63_s16 }
   0x9   :  { %28 = dma.hbm_to_vmem [thread:$0]  %s21_s8, 128, %s23_s12, [#allocation3], %s718_s9, %s718_s9, %s719_s10  }
   0xa   :  { %s721_s17 = smov [#allocation7]   ;;  %s722_s19 = smov [#allocation8]  }
   0xb   :  { %s50_s18 = sshll.u32 %s721_s17, 4  ;;  %s65_s3 = sshll.u32 %s722_s19, 4  ;;  %s51_s18 = int_to_ptr.vmem [resolvable:$true] %s50_s18  ;;  %s66_s3 = int_to_ptr.vmem [resolvable:$true] %s65_s3 }
   0xc   :  { %56 = dma.hbm_to_vmem [thread:$0]  %s49_s1, 1024, %s51_s18, [#allocation6], %s718_s9, %s718_s9, %s719_s10  }
   0xd   :  { %71 = dma.hbm_to_vmem [thread:$0]  %s64_s16, 1024, %s66_s3, [#allocation9], %s718_s9, %s718_s9, %s719_s10  }
   0xe   :  { %709 = dma.done.wait [#allocation3], 128  }
   0xf   :  { %710 = vsyncadd [#allocation3], 4294967168 }
  0x10   :  { %711 = dma.done.wait [#allocation6], 2048  }
  0x11   :  { %712 = vsyncadd [#allocation6], 4294965248 }
  0x12   :  { %713 = dma.done.wait [#allocation9], 1024  }
  0x13   :  { %714 = vsyncadd [#allocation9], 4294966272  ;;  %v545_v0 = vld [vmem:[#allocation5 + $0x38] sm:$0xff]  ;;  %v544_v1 = vld [vmem:[#allocation5 + $0x30] sm:$0xff]  ;;  %s422_s26 = sshll.u32 %s810_s7, 4  ;;  %s423_s26 = int_to_ptr.hbm [resolvable:$true] %s422_s26 }
  0x14   :  { %166 = vmatpush.bf16.msra.mxu0 %v545_v0  ;;  %v543_v2 = vld [vmem:[#allocation5 + $0x28] sm:$0xff]  ;;  %v542_v3 = vld [vmem:[#allocation5 + $0x20] sm:$0xff]  ;;  %v541_v4 = vld [vmem:[#allocation5 + $0x18] sm:$0xff] }
  0x15   :  { %v540_v5 = vld [vmem:[#allocation5 + $0x10] sm:$0xff]  ;;  %v539_v6 = vld [vmem:[#allocation5 + $0x8] sm:$0xff]  ;;  %v538_v7 = vld [vmem:[#allocation5] sm:$0xff] }
  0x16   :  { %v537_v8 = vld [vmem:[#allocation2] sm:$0xff]  ;;  %v552_v10 = vld [vmem:[#allocation7 + $0x30] sm:$0xff]  ;;  %v551_v11 = vld [vmem:[#allocation7 + $0x28] sm:$0xff] }
  0x17   :  { %v553_v9 = vld [vmem:[#allocation7 + $0x38] sm:$0xff]  ;;  %v550_v12 = vld [vmem:[#allocation7 + $0x20] sm:$0xff]  ;;  %v548_v14 = vld [vmem:[#allocation7 + $0x10] sm:$0xff] }
  0x18   :  { %167 = vmatpush.bf16.msra.mxu0 %v544_v1  ;;  %267 = vmatpush.bf16.msra.mxu1 %v553_v9  ;;  %v549_v13 = vld [vmem:[#allocation7 + $0x18] sm:$0xff]  ;;  %v547_v15 = vld [vmem:[#allocation7 + $0x8] sm:$0xff]  ;;  %v546_v16 = vld [vmem:[#allocation7] sm:$0xff] }
  0x19   :  { %v574_v17 = vld [vmem:[%s805_s2] ss:$0 sm:$0xff]  ;;  %v560_v42 = vld [vmem:[#allocation8 + $0x30] sm:$0xff]  ;;  %v559_v43 = vld [vmem:[#allocation8 + $0x28] sm:$0xff] }
  0x1a   :  { %v561_v41 = vld [vmem:[#allocation8 + $0x38] sm:$0xff]  ;;  %v558_v44 = vld [vmem:[#allocation8 + $0x20] sm:$0xff]  ;;  %v556_v46 = vld [vmem:[#allocation8 + $0x10] sm:$0xff] }
  0x1b   :  { %368 = vmatpush.bf16.msra.mxu2 %v561_v41  ;;  %v557_v45 = vld [vmem:[#allocation8 + $0x18] sm:$0xff]  ;;  %v555_v47 = vld [vmem:[#allocation8 + $0x8] sm:$0xff]  ;;  %v554_v48 = vld [vmem:[#allocation8] sm:$0xff] }
  0x1c   :  { %168 = vmatpush.bf16.msra.mxu0 %v543_v2  ;;  %268 = vmatpush.bf16.msra.mxu1 %v552_v10  ;;  %v575_v49 = vld [vmem:[%s807_s4] ss:$0 sm:$0xff] }
  0x1d   :  { %v576_v9 = vld [vmem:[%s809_s6] ss:$0 sm:$0xff]  ;;  %s723_s6 = smov [#allocation10]  }
  0x1e   :  { %s420_s23 = sshll.u32 %s723_s6, 4  ;;  %s421_s23 = int_to_ptr.vmem [resolvable:$true] %s420_s23 }
  0x1f   :  { %369 = vmatpush.bf16.msra.mxu2 %v560_v42 }
  0x20   :  { %169 = vmatpush.bf16.msra.mxu0 %v542_v3  ;;  %269 = vmatpush.bf16.msra.mxu1 %v551_v11 }
  0x23   :  { %370 = vmatpush.bf16.msra.mxu2 %v559_v43 }
  0x24   :  { %170 = vmatpush.bf16.msra.mxu0 %v541_v4  ;;  %270 = vmatpush.bf16.msra.mxu1 %v550_v12 }
  0x27   :  { %371 = vmatpush.bf16.msra.mxu2 %v558_v44 }
  0x28   :  { %171 = vmatpush.bf16.msra.mxu0 %v540_v5  ;;  %271 = vmatpush.bf16.msra.mxu1 %v549_v13 }
  0x2b   :  { %372 = vmatpush.bf16.msra.mxu2 %v557_v45 }
  0x2c   :  { %172 = vmatpush.bf16.msra.mxu0 %v539_v6  ;;  %272 = vmatpush.bf16.msra.mxu1 %v548_v14 }
  0x2f   :  { %373 = vmatpush.bf16.msra.mxu2 %v556_v46 }
  0x30   :  { %173 = vmatpush.bf16.msra.mxu0 %v538_v7  ;;  %273 = vmatpush.bf16.msra.mxu1 %v547_v15 }
  0x33   :  { %174 = vmatmul.bf16.vlgmr.msra.gmra.mxu0 %v537_v8  ;;  %374 = vmatpush.bf16.msra.mxu2 %v555_v47 }
  0x34   :  { %274 = vmatpush.bf16.msra.mxu1 %v546_v16 }
  0x37   :  { %375 = vmatpush.bf16.msra.mxu2 %v554_v48 }
  0xb0   :  { %v175_v18 = vpop.f32.mrf.mxu0 }
  0xb1   :  { %v176_v19 = vadd.f32 %v574_v17, %v175_v18 }
  0xb3   :  { %v182_v20 = vmul.f32 %v176_v19, %v176_v19  ;;  %v180_v35 = vmul.f32 0.5, %v176_v19 }
  0xb5   :  { %v184_v21 = vmul.f32 %v182_v20, %v176_v19 }
  0xb7   :  { %v186_v22 = vmul.f32 0.044715, %v184_v21 }
  0xb8   :  { %v177_v23 = vpop.f32.mrf.mxu0 }
  0xb9   :  { %v178_v24 = vadd.f32 %v574_v17, %v177_v23  ;;  %v188_v25 = vadd.f32 %v186_v22, %v176_v19 }
  0xbb   :  { %v183_v26 = vmul.f32 %v178_v24, %v178_v24  ;;  %v190_v28 = vmul.f32 0.7978846, %v188_v25  ;;  %v181_v36 = vmul.f32 0.5, %v178_v24 }
  0xbd   :  { %v185_v27 = vmul.f32 %v183_v26, %v178_v24  ;;  %577 = vtanh.f32 %v190_v28 }
  0xbf   :  { %v187_v29 = vmul.f32 0.044715, %v185_v27 }
  0xc1   :  { %v189_v30 = vadd.f32 %v187_v29, %v178_v24 }
  0xc3   :  { %v191_v31 = vmul.f32 0.7978846, %v189_v30  ;;  %v578_v32 = vpop.eup %577 }
  0xc4   :  { %v194_v33 = vadd.f32 1.0, %v578_v32 }
  0xc5   :  { %579 = vtanh.f32 %v191_v31 }
  0xc6   :  { %v196_v38 = vmul.f32 %v194_v33, %v180_v35 }
  0xcb   :  { %v580_v34 = vpop.eup %579 }
  0xcc   :  { %v195_v37 = vadd.f32 1.0, %v580_v34 }
  0xce   :  { %v197_v39 = vmul.f32 %v195_v37, %v181_v36 }
  0xd0   :  { %v198_v40 = vpack.c.bf16 %v197_v39, %v196_v38 }
  0xd2   :  { %275 = vmatmul.bf16.vlgmr.msra.gmra.mxu1 %v198_v40 }
 0x14f   :  { %v276_v50 = vpop.f32.mrf.mxu1 }
 0x150   :  { %v277_v51 = vadd.f32 %v575_v49, %v276_v50 }
 0x152   :  { %v283_v52 = vmul.f32 %v277_v51, %v277_v51  ;;  %v281_v3 = vmul.f32 0.5, %v277_v51 }
 0x154   :  { %v285_v53 = vmul.f32 %v283_v52, %v277_v51 }
 0x156   :  { %v287_v54 = vmul.f32 0.044715, %v285_v53 }
 0x157   :  { %v278_v55 = vpop.f32.mrf.mxu1 }
 0x158   :  { %v279_v56 = vadd.f32 %v575_v49, %v278_v55  ;;  %v289_v57 = vadd.f32 %v287_v54, %v277_v51 }
 0x15a   :  { %v284_v58 = vmul.f32 %v279_v56, %v279_v56  ;;  %v291_v60 = vmul.f32 0.7978846, %v289_v57  ;;  %v282_v4 = vmul.f32 0.5, %v279_v56 }
 0x15c   :  { %v286_v59 = vmul.f32 %v284_v58, %v279_v56  ;;  %581 = vtanh.f32 %v291_v60 }
 0x15e   :  { %v288_v61 = vmul.f32 0.044715, %v286_v59 }
 0x160   :  { %v290_v62 = vadd.f32 %v288_v61, %v279_v56 }
 0x162   :  { %v292_v63 = vmul.f32 0.7978846, %v290_v62  ;;  %v582_v0 = vpop.eup %581 }
 0x163   :  { %v295_v1 = vadd.f32 1.0, %v582_v0 }
 0x164   :  { %583 = vtanh.f32 %v292_v63 }
 0x165   :  { %v297_v6 = vmul.f32 %v295_v1, %v281_v3 }
 0x16a   :  { %v584_v2 = vpop.eup %583 }
 0x16b   :  { %v296_v5 = vadd.f32 1.0, %v584_v2 }
 0x16d   :  { %v298_v7 = vmul.f32 %v296_v5, %v282_v4 }
 0x16f   :  { %v299_v8 = vpack.c.bf16 %v298_v7, %v297_v6 }
 0x171   :  { %376 = vmatmul.bf16.vlgmr.msra.gmra.mxu2 %v299_v8 }
 0x1f4   :  { %v377_v10 = vpop.f32.mrf.mxu2 }
 0x1f5   :  { %v378_v11 = vadd.f32 %v576_v9, %v377_v10 }
 0x1f7   :  { %v382_v12 = vmul.f32 %v378_v11, %v378_v11 }
 0x1f9   :  { %384 = vadd.xlane.f32.xlu0 %v382_v12 }
 0x1fc   :  { %v379_v13 = vpop.f32.mrf.mxu2 }
 0x1fd   :  { %v380_v14 = vadd.f32 %v576_v9, %v379_v13 }
 0x1ff   :  { %v383_v15 = vmul.f32 %v380_v14, %v380_v14 }
 0x201   :  { %386 = vadd.xlane.f32.xlu0 %v383_v15 }
 0x26c   :  { %v385_v16 = vpop.xlane.xlu0 %384 }
 0x26d   :  { %v388_v17 = vmax.f32 %v385_v16, 1e-24 }
 0x26f   :  { %585 = vrsqrt.f32 %v388_v17  ;;  %vm396_vm1 = vweird.f32 %v388_v17 }
 0x274   :  { %v387_v18 = vpop.xlane.xlu0 %386 }
 0x275   :  { %v586_v19 = vpop.eup %585  ;;  %v389_v20 = vmax.f32 %v387_v18, 1e-24 }
 0x276   :  { %v391_v21 = vmul.f32 %v586_v19, %v388_v17  ;;  %vm397_vm0 = vweird.f32 %v586_v19 }
 0x277   :  { %587 = vrsqrt.f32 %v389_v20  ;;  %vm398_vm3 = vmor %vm396_vm1, %vm397_vm0  ;;  %vm406_vm4 = vweird.f32 %v389_v20 }
 0x278   :  { %v392_v22 = vmul.f32 %v586_v19, %v391_v21 }
 0x27a   :  { %v393_v23 = vmul.f32 0.5, %v392_v22 }
 0x27c   :  { %v394_v25 = vsub.f32 1.5, %v393_v23 }
 0x27d   :  { %v588_v24 = vpop.eup %587 }
 0x27e   :  { %v401_v26 = vmul.f32 %v588_v24, %v389_v20  ;;  %v395_v28 = vmul.f32 %v586_v19, %v394_v25  ;;  %vm407_vm2 = vweird.f32 %v588_v24 }
 0x27f   :  { %vm408_vm5 = vmor %vm406_vm4, %vm407_vm2 }
 0x280   :  { %v402_v27 = vmul.f32 %v588_v24, %v401_v26  ;;  %v399_v31 = vsel %vm398_vm3, %v586_v19, %v395_v28 }
 0x281   :  { %v410_v34 = vmul.f32 %v399_v31, %v378_v11 }
 0x282   :  { %v403_v29 = vmul.f32 0.5, %v402_v27 }
 0x284   :  { %v404_v30 = vsub.f32 1.5, %v403_v29 }
 0x286   :  { %v405_v32 = vmul.f32 %v588_v24, %v404_v30 }
 0x288   :  { %v409_v33 = vsel %vm408_vm5, %v588_v24, %v405_v32 }
 0x289   :  { %v411_v35 = vmul.f32 %v409_v33, %v380_v14 }
 0x28b   :  { %v565_v36 = vpack.c.bf16 %v411_v35, %v410_v34 }
 0x28d   :  { %566 = vst [vmem:[#allocation10] sm:$0xff] %v565_v36  }
 0x28e   :  { %428 = dma.vmem_to_hbm [thread:$0]  %s421_s23, 128, %s423_s26, [#allocation4], %s718_s9, %s718_s9, %s719_s10  }
 0x28f   :  { %715 = dma.done.wait [#allocation4], 128  }
 0x290   :  { %716 = vsyncadd [#allocation4], 4294967168 }
 0x291   :  { %433 = vsyncpa [#allocation3], 1 }
 0x292   :  { %434 = vsyncpa [#allocation6], 1 }
 0x293   :  { %435 = vsyncpa [#allocation9], 1 }
 0x294   :  { %436 = vsyncpa [#allocation4], 1 }

</bundles_post_ra>
